<compile_context>
chip_gen: v5e
topology: v5e:2x2
jax: 0.10.0
libtpu: 0.0.40
codegen_flags: <defaults>
</compile_context>

<pallas_src>
import math
import jax
import jax.numpy as jnp
from jax import lax
from jax.experimental import pallas as pl
from jax.experimental.pallas import tpu as pltpu

EMBED_DIM = 32          # embed_dim
NUM_HEADS = 4           # num_heads
NUM_PATCHES = 8         # sequence length (num patches)
HIDDEN = 64             # num_hidden_neurons
BATCH = 2
LN_EPS = 1e-5
HEAD_DIM = EMBED_DIM // NUM_HEADS


def _layernorm(x, g, b):
    m = jnp.mean(x, axis=-1, keepdims=True)
    c = x - m
    v = jnp.mean(c * c, axis=-1, keepdims=True)
    return c * lax.rsqrt(v + LN_EPS) * g + b


def lsa_block_kernel(temp_ref, x_ref, bias_ref,
                     wq_ref, wk_ref, wv_ref, bq_ref, bk_ref, bv_ref,
                     wo_ref, bo_ref,
                     g1_ref, be1_ref,
                     w1_ref, b1_ref, w2_ref, b2_ref,
                     g2_ref, be2_ref,
                     out_ref):
    x = x_ref[...].astype(jnp.float32)            # (B*N, D): all batches in one slab

    # Fold learnable 1/temperature and the 1/sqrt(head_dim) attention scale into
    # a single scalar multiply on Q (bias scaled once too):
    #   Q_scaled = ((x/temp) @ Wq + bq) * scale = (x @ Wq) * (scale/temp) + bq*scale
    scale = 1.0 / math.sqrt(HEAD_DIM)
    inv_temp = 1.0 / temp_ref[0]
    q_mul = scale * inv_temp

    Q = jnp.dot(x, wq_ref[...], preferred_element_type=jnp.float32) * q_mul \
        + bq_ref[...] * scale
    K = jnp.dot(x, wk_ref[...], preferred_element_type=jnp.float32) + bk_ref[...]
    V = jnp.dot(x, wv_ref[...], preferred_element_type=jnp.float32) + bv_ref[...]

    bias = bias_ref[...]                          # (B*N, B*N): -1e30 diag + cross-batch

    # Head-column masks (constants; hoisted out of the head loop).
    dcol = lax.broadcasted_iota(jnp.int32, (1, EMBED_DIM), 1)
    head_masks = [
        ((dcol >= h * HEAD_DIM) & (dcol < (h + 1) * HEAD_DIM)).astype(jnp.float32)
        for h in range(NUM_HEADS)
    ]

    contract_last = (((1,), (1,)), ((), ()))      # A @ B.T without materializing B.T
    attn = jnp.zeros_like(x)
    for h in range(NUM_HEADS):                    # static unroll; full-width slabs only
        mh = head_masks[h]
        s = lax.dot_general(Q, K * mh, contract_last,
                            preferred_element_type=jnp.float32) + bias
        s = s - jnp.max(s, axis=-1, keepdims=True)
        p = jnp.exp(s)
        p = p * pl.reciprocal(jnp.sum(p, axis=-1, keepdims=True), approx=True)
        # V masked to head-h columns => head output lands in its own column block.
        attn = attn + jnp.dot(p, V * mh, preferred_element_type=jnp.float32)

    attn = jnp.dot(attn, wo_ref[...], preferred_element_type=jnp.float32) + bo_ref[...]

    # residual + first LayerNorm
    v1 = _layernorm(x + attn, g1_ref[...], be1_ref[...])

    # FeedForward: Linear(D->H) -> GELU -> Linear(H->D)  (dropout = identity in eval)
    h1 = jnp.dot(v1, w1_ref[...], preferred_element_type=jnp.float32) + b1_ref[...]
    h1 = jax.nn.gelu(h1, approximate=True)
    ff = jnp.dot(h1, w2_ref[...], preferred_element_type=jnp.float32) + b2_ref[...]

    # residual + second LayerNorm (final dropout is identity in eval mode)
    v2 = _layernorm(v1 + ff, g2_ref[...], be2_ref[...])
    out_ref[...] = v2.astype(out_ref.dtype)


def transformer_lsa_block(x, params):
    B, N, D = x.shape
    H = HIDDEN
    BN = B * N
    x2 = x.reshape(BN, D)

    # Additive attention bias: LSA diagonal self-mask + block-diagonal batch mask
    # (tokens attend only within their own batch element). Constant, built once.
    row = jnp.arange(BN)[:, None]
    col = jnp.arange(BN)[None, :]
    banned = (row == col) | ((row // N) != (col // N))
    attn_bias = jnp.where(banned, -1e30, 0.0).astype(jnp.float32)

    def full(shape):
        zeros = (0,) * len(shape)
        return pl.BlockSpec(shape, lambda i, z=zeros: z)

    in_specs = [
        pl.BlockSpec(memory_space=pltpu.SMEM),       # temperature (1,)
        full((BN, D)),                               # x (all batches, one slab)
        full((BN, BN)),                              # additive attention bias
        full((D, D)), full((D, D)), full((D, D)),    # wq, wk, wv
        full((1, D)), full((1, D)), full((1, D)),    # bq, bk, bv
        full((D, D)), full((1, D)),                  # wo, bo
        full((1, D)), full((1, D)),                  # ln1 gamma, beta
        full((D, H)), full((1, H)), full((H, D)), full((1, D)),   # ff w1, b1, w2, b2
        full((1, D)), full((1, D)),                  # ln2 gamma, beta
    ]

    out = pl.pallas_call(
        lsa_block_kernel,
        grid=(1,),                                   # single step: everything fits VMEM
        in_specs=in_specs,
        out_specs=full((BN, D)),
        out_shape=jax.ShapeDtypeStruct((BN, D), jnp.float32),
        compiler_params=pltpu.CompilerParams(dimension_semantics=("arbitrary",)),
    )(params["temperature"], x2, attn_bias,
      params["wq"], params["wk"], params["wv"],
      params["bq"], params["bk"], params["bv"],
      params["wo"], params["bo"],
      params["g1"], params["be1"],
      params["w1"], params["b1"], params["w2"], params["b2"],
      params["g2"], params["be2"])
    return out.reshape(B, N, D)


def init_params(key):
    D, H = EMBED_DIM, HIDDEN
    ks = jax.random.split(key, 6)

    def w(k, shape, scale=0.02):
        return (scale * jax.random.normal(k, shape)).astype(jnp.float32)

    zeros = lambda shape: jnp.zeros(shape, jnp.float32)
    ones = lambda shape: jnp.ones(shape, jnp.float32)
    return dict(
        temperature=ones((1,)),                      # nn.Parameter(torch.ones(1))
        # attention in/out projections (already (in, out) for x @ W)
        wq=w(ks[0], (D, D)), wk=w(ks[1], (D, D)), wv=w(ks[2], (D, D)),
        bq=zeros((1, D)), bk=zeros((1, D)), bv=zeros((1, D)),
        wo=w(ks[3], (D, D)), bo=zeros((1, D)),
        # LayerNorms (PyTorch default init: gamma=1, beta=0)
        g1=ones((1, D)), be1=zeros((1, D)),
        g2=ones((1, D)), be2=zeros((1, D)),
        # FeedForward
        w1=w(ks[4], (D, H)), b1=zeros((1, H)),
        w2=w(ks[5], (H, D)), b2=zeros((1, D)),
    )


if __name__ == "__main__":
    key = jax.random.PRNGKey(0)
    kx, kp = jax.random.split(key)
    x = jax.random.normal(kx, (BATCH, NUM_PATCHES, EMBED_DIM), jnp.float32)
    params = init_params(kp)

    out = transformer_lsa_block(x, params)
    jax.block_until_ready(out)
    assert out.shape == (BATCH, NUM_PATCHES, EMBED_DIM)
    assert bool(jnp.all(jnp.isfinite(out)))
    print("KERNEL_OK")
</pallas_src>

<mosaic_0001>
module attributes {stable_mosaic.version = 11 : i64} {
  func.func @lsa_block_kernel(%arg0: i32, %arg1: memref<1xf32, #tpu.memory_space<smem>>, %arg2: memref<16x32xf32, #tpu.memory_space<vmem>>, %arg3: memref<16x16xf32, #tpu.memory_space<vmem>>, %arg4: memref<32x32xf32, #tpu.memory_space<vmem>>, %arg5: memref<32x32xf32, #tpu.memory_space<vmem>>, %arg6: memref<32x32xf32, #tpu.memory_space<vmem>>, %arg7: memref<1x32xf32, #tpu.memory_space<vmem>>, %arg8: memref<1x32xf32, #tpu.memory_space<vmem>>, %arg9: memref<1x32xf32, #tpu.memory_space<vmem>>, %arg10: memref<32x32xf32, #tpu.memory_space<vmem>>, %arg11: memref<1x32xf32, #tpu.memory_space<vmem>>, %arg12: memref<1x32xf32, #tpu.memory_space<vmem>>, %arg13: memref<1x32xf32, #tpu.memory_space<vmem>>, %arg14: memref<32x64xf32, #tpu.memory_space<vmem>>, %arg15: memref<1x64xf32, #tpu.memory_space<vmem>>, %arg16: memref<64x32xf32, #tpu.memory_space<vmem>>, %arg17: memref<1x32xf32, #tpu.memory_space<vmem>>, %arg18: memref<1x32xf32, #tpu.memory_space<vmem>>, %arg19: memref<1x32xf32, #tpu.memory_space<vmem>>, %arg20: memref<16x32xf32, #tpu.memory_space<vmem>>) attributes {dimension_semantics = [#tpu.dimension_semantics<arbitrary>], iteration_bounds = array<i64: 1>, scalar_prefetch = 0 : i64, scratch_operands = 0 : i64, tpu.core_type = #tpu.core_type<tc>, window_params = [{transform_indices = @transform_0, window_bounds = array<i64: 1>}, {pipeline_mode = #tpu.pipeline_mode<synchronous>, transform_indices = @transform_1, window_bounds = array<i64: 16, 32>}, {pipeline_mode = #tpu.pipeline_mode<synchronous>, transform_indices = @transform_2, window_bounds = array<i64: 16, 16>}, {pipeline_mode = #tpu.pipeline_mode<synchronous>, transform_indices = @transform_3, window_bounds = array<i64: 32, 32>}, {pipeline_mode = #tpu.pipeline_mode<synchronous>, transform_indices = @transform_4, window_bounds = array<i64: 32, 32>}, {pipeline_mode = #tpu.pipeline_mode<synchronous>, transform_indices = @transform_5, window_bounds = array<i64: 32, 32>}, {pipeline_mode = #tpu.pipeline_mode<synchronous>, transform_indices = @transform_6, window_bounds = array<i64: 1, 32>}, {pipeline_mode = #tpu.pipeline_mode<synchronous>, transform_indices = @transform_7, window_bounds = array<i64: 1, 32>}, {pipeline_mode = #tpu.pipeline_mode<synchronous>, transform_indices = @transform_8, window_bounds = array<i64: 1, 32>}, {pipeline_mode = #tpu.pipeline_mode<synchronous>, transform_indices = @transform_9, window_bounds = array<i64: 32, 32>}, {pipeline_mode = #tpu.pipeline_mode<synchronous>, transform_indices = @transform_10, window_bounds = array<i64: 1, 32>}, {pipeline_mode = #tpu.pipeline_mode<synchronous>, transform_indices = @transform_11, window_bounds = array<i64: 1, 32>}, {pipeline_mode = #tpu.pipeline_mode<synchronous>, transform_indices = @transform_12, window_bounds = array<i64: 1, 32>}, {pipeline_mode = #tpu.pipeline_mode<synchronous>, transform_indices = @transform_13, window_bounds = array<i64: 32, 64>}, {pipeline_mode = #tpu.pipeline_mode<synchronous>, transform_indices = @transform_14, window_bounds = array<i64: 1, 64>}, {pipeline_mode = #tpu.pipeline_mode<synchronous>, transform_indices = @transform_15, window_bounds = array<i64: 64, 32>}, {pipeline_mode = #tpu.pipeline_mode<synchronous>, transform_indices = @transform_16, window_bounds = array<i64: 1, 32>}, {pipeline_mode = #tpu.pipeline_mode<synchronous>, transform_indices = @transform_17, window_bounds = array<i64: 1, 32>}, {pipeline_mode = #tpu.pipeline_mode<synchronous>, transform_indices = @transform_18, window_bounds = array<i64: 1, 32>}, {pipeline_mode = #tpu.pipeline_mode<synchronous>, transform_indices = @transform_19, window_bounds = array<i64: 16, 32>}]} {
    %c0 = arith.constant 0 : index
    %c0_0 = arith.constant 0 : index
    %0 = vector.load %arg2[%c0, %c0_0] : memref<16x32xf32, #tpu.memory_space<vmem>>, vector<16x32xf32>
    %c0_1 = arith.constant 0 : index
    %1 = memref.load %arg1[%c0_1] : memref<1xf32, #tpu.memory_space<smem>>
    %cst = arith.constant 1.000000e+00 : f32
    %2 = arith.divf %cst, %1 : f32
    %cst_2 = arith.constant 0.353553385 : f32
    %3 = arith.mulf %cst_2, %2 : f32
    %c0_3 = arith.constant 0 : index
    %c0_4 = arith.constant 0 : index
    %4 = vector.load %arg4[%c0_3, %c0_4] : memref<32x32xf32, #tpu.memory_space<vmem>>, vector<32x32xf32>
    %cst_5 = arith.constant dense<0.000000e+00> : vector<16x32xf32>
    %5 = tpu.matmul %0, %4, %cst_5 {dimension_numbers = #tpu.dot_dimension_numbers<[1], [0], [0], [1], [0, 0, 1, 1], [], []>} : vector<16x32xf32>, vector<32x32xf32>, vector<16x32xf32> -> vector<16x32xf32>
    %6 = vector.broadcast %3 : f32 to vector<16x32xf32>
    %7 = arith.mulf %5, %6 : vector<16x32xf32>
    %c0_6 = arith.constant 0 : index
    %c0_7 = arith.constant 0 : index
    %8 = vector.load %arg7[%c0_6, %c0_7] : memref<1x32xf32, #tpu.memory_space<vmem>>, vector<1x32xf32>
    %cst_8 = arith.constant 0.353553385 : f32
    %9 = vector.broadcast %cst_8 : f32 to vector<1x32xf32>
    %10 = arith.mulf %8, %9 : vector<1x32xf32>
    %11 = vector.broadcast %10 : vector<1x32xf32> to vector<16x32xf32>
    %12 = arith.addf %7, %11 : vector<16x32xf32>
    %c0_9 = arith.constant 0 : index
    %c0_10 = arith.constant 0 : index
    %13 = vector.load %arg5[%c0_9, %c0_10] : memref<32x32xf32, #tpu.memory_space<vmem>>, vector<32x32xf32>
    %cst_11 = arith.constant dense<0.000000e+00> : vector<16x32xf32>
    %14 = tpu.matmul %0, %13, %cst_11 {dimension_numbers = #tpu.dot_dimension_numbers<[1], [0], [0], [1], [0, 0, 1, 1], [], []>} : vector<16x32xf32>, vector<32x32xf32>, vector<16x32xf32> -> vector<16x32xf32>
    %c0_12 = arith.constant 0 : index
    %c0_13 = arith.constant 0 : index
    %15 = vector.load %arg8[%c0_12, %c0_13] : memref<1x32xf32, #tpu.memory_space<vmem>>, vector<1x32xf32>
    %16 = vector.broadcast %15 : vector<1x32xf32> to vector<16x32xf32>
    %17 = arith.addf %14, %16 : vector<16x32xf32>
    %c0_14 = arith.constant 0 : index
    %c0_15 = arith.constant 0 : index
    %18 = vector.load %arg6[%c0_14, %c0_15] : memref<32x32xf32, #tpu.memory_space<vmem>>, vector<32x32xf32>
    %cst_16 = arith.constant dense<0.000000e+00> : vector<16x32xf32>
    %19 = tpu.matmul %0, %18, %cst_16 {dimension_numbers = #tpu.dot_dimension_numbers<[1], [0], [0], [1], [0, 0, 1, 1], [], []>} : vector<16x32xf32>, vector<32x32xf32>, vector<16x32xf32> -> vector<16x32xf32>
    %c0_17 = arith.constant 0 : index
    %c0_18 = arith.constant 0 : index
    %20 = vector.load %arg9[%c0_17, %c0_18] : memref<1x32xf32, #tpu.memory_space<vmem>>, vector<1x32xf32>
    %21 = vector.broadcast %20 : vector<1x32xf32> to vector<16x32xf32>
    %22 = arith.addf %19, %21 : vector<16x32xf32>
    %c0_19 = arith.constant 0 : index
    %c0_20 = arith.constant 0 : index
    %23 = vector.load %arg3[%c0_19, %c0_20] : memref<16x16xf32, #tpu.memory_space<vmem>>, vector<16x16xf32>
    %24 = tpu.iota {dimensions = array<i32: 1>} : vector<1x32xi32>
    %c0_i32 = arith.constant 0 : i32
    %25 = vector.broadcast %c0_i32 : i32 to vector<1x32xi32>
    %26 = arith.cmpi sge, %24, %25 : vector<1x32xi32>
    %c8_i32 = arith.constant 8 : i32
    %27 = vector.broadcast %c8_i32 : i32 to vector<1x32xi32>
    %28 = arith.cmpi slt, %24, %27 : vector<1x32xi32>
    %29 = arith.andi %26, %28 : vector<1x32xi1>
    %30 = arith.extui %29 : vector<1x32xi1> to vector<1x32xi32>
    %31 = arith.sitofp %30 : vector<1x32xi32> to vector<1x32xf32>
    %c8_i32_21 = arith.constant 8 : i32
    %32 = vector.broadcast %c8_i32_21 : i32 to vector<1x32xi32>
    %33 = arith.cmpi sge, %24, %32 : vector<1x32xi32>
    %c16_i32 = arith.constant 16 : i32
    %34 = vector.broadcast %c16_i32 : i32 to vector<1x32xi32>
    %35 = arith.cmpi slt, %24, %34 : vector<1x32xi32>
    %36 = arith.andi %33, %35 : vector<1x32xi1>
    %37 = arith.extui %36 : vector<1x32xi1> to vector<1x32xi32>
    %38 = arith.sitofp %37 : vector<1x32xi32> to vector<1x32xf32>
    %c16_i32_22 = arith.constant 16 : i32
    %39 = vector.broadcast %c16_i32_22 : i32 to vector<1x32xi32>
    %40 = arith.cmpi sge, %24, %39 : vector<1x32xi32>
    %c24_i32 = arith.constant 24 : i32
    %41 = vector.broadcast %c24_i32 : i32 to vector<1x32xi32>
    %42 = arith.cmpi slt, %24, %41 : vector<1x32xi32>
    %43 = arith.andi %40, %42 : vector<1x32xi1>
    %44 = arith.extui %43 : vector<1x32xi1> to vector<1x32xi32>
    %45 = arith.sitofp %44 : vector<1x32xi32> to vector<1x32xf32>
    %c24_i32_23 = arith.constant 24 : i32
    %46 = vector.broadcast %c24_i32_23 : i32 to vector<1x32xi32>
    %47 = arith.cmpi sge, %24, %46 : vector<1x32xi32>
    %c32_i32 = arith.constant 32 : i32
    %48 = vector.broadcast %c32_i32 : i32 to vector<1x32xi32>
    %49 = arith.cmpi slt, %24, %48 : vector<1x32xi32>
    %50 = arith.andi %47, %49 : vector<1x32xi1>
    %51 = arith.extui %50 : vector<1x32xi1> to vector<1x32xi32>
    %52 = arith.sitofp %51 : vector<1x32xi32> to vector<1x32xf32>
    %cst_24 = arith.constant 0.000000e+00 : f32
    %53 = vector.broadcast %cst_24 : f32 to vector<16x32xf32>
    %54 = vector.broadcast %31 : vector<1x32xf32> to vector<16x32xf32>
    %55 = arith.mulf %17, %54 : vector<16x32xf32>
    %cst_25 = arith.constant dense<0.000000e+00> : vector<16x16xf32>
    %56 = tpu.matmul %12, %55, %cst_25 {dimension_numbers = #tpu.dot_dimension_numbers<[1], [1], [0], [0], [0, 0, 1, 0], [], []>} : vector<16x32xf32>, vector<16x32xf32>, vector<16x16xf32> -> vector<16x16xf32>
    %57 = arith.addf %56, %23 : vector<16x16xf32>
    %cst_26 = arith.constant dense<0xFF800000> : vector<16xf32>
    %58 = vector.multi_reduction <maximumf>, %57, %cst_26 [1] : vector<16x16xf32> to vector<16xf32>
    %59 = vector.shape_cast %58 : vector<16xf32> to vector<16x1xf32>
    %60 = vector.broadcast %59 : vector<16x1xf32> to vector<16x16xf32>
    %61 = arith.subf %57, %60 : vector<16x16xf32>
    %62 = math.exp %61 : vector<16x16xf32>
    %cst_27 = arith.constant dense<0.000000e+00> : vector<16xf32>
    %63 = vector.multi_reduction <add>, %62, %cst_27 [1] : vector<16x16xf32> to vector<16xf32>
    %64 = vector.shape_cast %63 : vector<16xf32> to vector<16x1xf32>
    %65 = tpu.reciprocal %64 {approx = true} : vector<16x1xf32> -> vector<16x1xf32>
    %66 = vector.broadcast %65 : vector<16x1xf32> to vector<16x16xf32>
    %67 = arith.mulf %62, %66 : vector<16x16xf32>
    %68 = vector.broadcast %31 : vector<1x32xf32> to vector<16x32xf32>
    %69 = arith.mulf %22, %68 : vector<16x32xf32>
    %cst_28 = arith.constant dense<0.000000e+00> : vector<16x32xf32>
    %70 = tpu.matmul %67, %69, %cst_28 {dimension_numbers = #tpu.dot_dimension_numbers<[1], [0], [0], [1], [0, 0, 1, 1], [], []>} : vector<16x16xf32>, vector<16x32xf32>, vector<16x32xf32> -> vector<16x32xf32>
    %71 = arith.addf %53, %70 : vector<16x32xf32>
    %72 = vector.broadcast %38 : vector<1x32xf32> to vector<16x32xf32>
    %73 = arith.mulf %17, %72 : vector<16x32xf32>
    %cst_29 = arith.constant dense<0.000000e+00> : vector<16x16xf32>
    %74 = tpu.matmul %12, %73, %cst_29 {dimension_numbers = #tpu.dot_dimension_numbers<[1], [1], [0], [0], [0, 0, 1, 0], [], []>} : vector<16x32xf32>, vector<16x32xf32>, vector<16x16xf32> -> vector<16x16xf32>
    %75 = arith.addf %74, %23 : vector<16x16xf32>
    %cst_30 = arith.constant dense<0xFF800000> : vector<16xf32>
    %76 = vector.multi_reduction <maximumf>, %75, %cst_30 [1] : vector<16x16xf32> to vector<16xf32>
    %77 = vector.shape_cast %76 : vector<16xf32> to vector<16x1xf32>
    %78 = vector.broadcast %77 : vector<16x1xf32> to vector<16x16xf32>
    %79 = arith.subf %75, %78 : vector<16x16xf32>
    %80 = math.exp %79 : vector<16x16xf32>
    %cst_31 = arith.constant dense<0.000000e+00> : vector<16xf32>
    %81 = vector.multi_reduction <add>, %80, %cst_31 [1] : vector<16x16xf32> to vector<16xf32>
    %82 = vector.shape_cast %81 : vector<16xf32> to vector<16x1xf32>
    %83 = tpu.reciprocal %82 {approx = true} : vector<16x1xf32> -> vector<16x1xf32>
    %84 = vector.broadcast %83 : vector<16x1xf32> to vector<16x16xf32>
    %85 = arith.mulf %80, %84 : vector<16x16xf32>
    %86 = vector.broadcast %38 : vector<1x32xf32> to vector<16x32xf32>
    %87 = arith.mulf %22, %86 : vector<16x32xf32>
    %cst_32 = arith.constant dense<0.000000e+00> : vector<16x32xf32>
    %88 = tpu.matmul %85, %87, %cst_32 {dimension_numbers = #tpu.dot_dimension_numbers<[1], [0], [0], [1], [0, 0, 1, 1], [], []>} : vector<16x16xf32>, vector<16x32xf32>, vector<16x32xf32> -> vector<16x32xf32>
    %89 = arith.addf %71, %88 : vector<16x32xf32>
    %90 = vector.broadcast %45 : vector<1x32xf32> to vector<16x32xf32>
    %91 = arith.mulf %17, %90 : vector<16x32xf32>
    %cst_33 = arith.constant dense<0.000000e+00> : vector<16x16xf32>
    %92 = tpu.matmul %12, %91, %cst_33 {dimension_numbers = #tpu.dot_dimension_numbers<[1], [1], [0], [0], [0, 0, 1, 0], [], []>} : vector<16x32xf32>, vector<16x32xf32>, vector<16x16xf32> -> vector<16x16xf32>
    %93 = arith.addf %92, %23 : vector<16x16xf32>
    %cst_34 = arith.constant dense<0xFF800000> : vector<16xf32>
    %94 = vector.multi_reduction <maximumf>, %93, %cst_34 [1] : vector<16x16xf32> to vector<16xf32>
    %95 = vector.shape_cast %94 : vector<16xf32> to vector<16x1xf32>
    %96 = vector.broadcast %95 : vector<16x1xf32> to vector<16x16xf32>
    %97 = arith.subf %93, %96 : vector<16x16xf32>
    %98 = math.exp %97 : vector<16x16xf32>
    %cst_35 = arith.constant dense<0.000000e+00> : vector<16xf32>
    %99 = vector.multi_reduction <add>, %98, %cst_35 [1] : vector<16x16xf32> to vector<16xf32>
    %100 = vector.shape_cast %99 : vector<16xf32> to vector<16x1xf32>
    %101 = tpu.reciprocal %100 {approx = true} : vector<16x1xf32> -> vector<16x1xf32>
    %102 = vector.broadcast %101 : vector<16x1xf32> to vector<16x16xf32>
    %103 = arith.mulf %98, %102 : vector<16x16xf32>
    %104 = vector.broadcast %45 : vector<1x32xf32> to vector<16x32xf32>
    %105 = arith.mulf %22, %104 : vector<16x32xf32>
    %cst_36 = arith.constant dense<0.000000e+00> : vector<16x32xf32>
    %106 = tpu.matmul %103, %105, %cst_36 {dimension_numbers = #tpu.dot_dimension_numbers<[1], [0], [0], [1], [0, 0, 1, 1], [], []>} : vector<16x16xf32>, vector<16x32xf32>, vector<16x32xf32> -> vector<16x32xf32>
    %107 = arith.addf %89, %106 : vector<16x32xf32>
    %108 = vector.broadcast %52 : vector<1x32xf32> to vector<16x32xf32>
    %109 = arith.mulf %17, %108 : vector<16x32xf32>
    %cst_37 = arith.constant dense<0.000000e+00> : vector<16x16xf32>
    %110 = tpu.matmul %12, %109, %cst_37 {dimension_numbers = #tpu.dot_dimension_numbers<[1], [1], [0], [0], [0, 0, 1, 0], [], []>} : vector<16x32xf32>, vector<16x32xf32>, vector<16x16xf32> -> vector<16x16xf32>
    %111 = arith.addf %110, %23 : vector<16x16xf32>
    %cst_38 = arith.constant dense<0xFF800000> : vector<16xf32>
    %112 = vector.multi_reduction <maximumf>, %111, %cst_38 [1] : vector<16x16xf32> to vector<16xf32>
    %113 = vector.shape_cast %112 : vector<16xf32> to vector<16x1xf32>
    %114 = vector.broadcast %113 : vector<16x1xf32> to vector<16x16xf32>
    %115 = arith.subf %111, %114 : vector<16x16xf32>
    %116 = math.exp %115 : vector<16x16xf32>
    %cst_39 = arith.constant dense<0.000000e+00> : vector<16xf32>
    %117 = vector.multi_reduction <add>, %116, %cst_39 [1] : vector<16x16xf32> to vector<16xf32>
    %118 = vector.shape_cast %117 : vector<16xf32> to vector<16x1xf32>
    %119 = tpu.reciprocal %118 {approx = true} : vector<16x1xf32> -> vector<16x1xf32>
    %120 = vector.broadcast %119 : vector<16x1xf32> to vector<16x16xf32>
    %121 = arith.mulf %116, %120 : vector<16x16xf32>
    %122 = vector.broadcast %52 : vector<1x32xf32> to vector<16x32xf32>
    %123 = arith.mulf %22, %122 : vector<16x32xf32>
    %cst_40 = arith.constant dense<0.000000e+00> : vector<16x32xf32>
    %124 = tpu.matmul %121, %123, %cst_40 {dimension_numbers = #tpu.dot_dimension_numbers<[1], [0], [0], [1], [0, 0, 1, 1], [], []>} : vector<16x16xf32>, vector<16x32xf32>, vector<16x32xf32> -> vector<16x32xf32>
    %125 = arith.addf %107, %124 : vector<16x32xf32>
    %c0_41 = arith.constant 0 : index
    %c0_42 = arith.constant 0 : index
    %126 = vector.load %arg10[%c0_41, %c0_42] : memref<32x32xf32, #tpu.memory_space<vmem>>, vector<32x32xf32>
    %cst_43 = arith.constant dense<0.000000e+00> : vector<16x32xf32>
    %127 = tpu.matmul %125, %126, %cst_43 {dimension_numbers = #tpu.dot_dimension_numbers<[1], [0], [0], [1], [0, 0, 1, 1], [], []>} : vector<16x32xf32>, vector<32x32xf32>, vector<16x32xf32> -> vector<16x32xf32>
    %c0_44 = arith.constant 0 : index
    %c0_45 = arith.constant 0 : index
    %128 = vector.load %arg11[%c0_44, %c0_45] : memref<1x32xf32, #tpu.memory_space<vmem>>, vector<1x32xf32>
    %129 = vector.broadcast %128 : vector<1x32xf32> to vector<16x32xf32>
    %130 = arith.addf %127, %129 : vector<16x32xf32>
    %131 = arith.addf %0, %130 : vector<16x32xf32>
    %c0_46 = arith.constant 0 : index
    %c0_47 = arith.constant 0 : index
    %132 = vector.load %arg12[%c0_46, %c0_47] : memref<1x32xf32, #tpu.memory_space<vmem>>, vector<1x32xf32>
    %c0_48 = arith.constant 0 : index
    %c0_49 = arith.constant 0 : index
    %133 = vector.load %arg13[%c0_48, %c0_49] : memref<1x32xf32, #tpu.memory_space<vmem>>, vector<1x32xf32>
    %cst_50 = arith.constant dense<0.000000e+00> : vector<16xf32>
    %134 = vector.multi_reduction <add>, %131, %cst_50 [1] : vector<16x32xf32> to vector<16xf32>
    %135 = vector.shape_cast %134 : vector<16xf32> to vector<16x1xf32>
    %cst_51 = arith.constant 3.200000e+01 : f32
    %136 = vector.broadcast %cst_51 : f32 to vector<16x1xf32>
    %137 = arith.divf %135, %136 : vector<16x1xf32>
    %138 = vector.broadcast %137 : vector<16x1xf32> to vector<16x32xf32>
    %139 = arith.subf %131, %138 : vector<16x32xf32>
    %140 = arith.mulf %139, %139 : vector<16x32xf32>
    %cst_52 = arith.constant dense<0.000000e+00> : vector<16xf32>
    %141 = vector.multi_reduction <add>, %140, %cst_52 [1] : vector<16x32xf32> to vector<16xf32>
    %142 = vector.shape_cast %141 : vector<16xf32> to vector<16x1xf32>
    %cst_53 = arith.constant 3.200000e+01 : f32
    %143 = vector.broadcast %cst_53 : f32 to vector<16x1xf32>
    %144 = arith.divf %142, %143 : vector<16x1xf32>
    %cst_54 = arith.constant 9.99999974E-6 : f32
    %145 = vector.broadcast %cst_54 : f32 to vector<16x1xf32>
    %146 = arith.addf %144, %145 : vector<16x1xf32>
    %147 = math.rsqrt %146 : vector<16x1xf32>
    %148 = vector.broadcast %147 : vector<16x1xf32> to vector<16x32xf32>
    %149 = arith.mulf %139, %148 : vector<16x32xf32>
    %150 = vector.broadcast %132 : vector<1x32xf32> to vector<16x32xf32>
    %151 = arith.mulf %149, %150 : vector<16x32xf32>
    %152 = vector.broadcast %133 : vector<1x32xf32> to vector<16x32xf32>
    %153 = arith.addf %151, %152 : vector<16x32xf32>
    %c0_55 = arith.constant 0 : index
    %c0_56 = arith.constant 0 : index
    %154 = vector.load %arg14[%c0_55, %c0_56] : memref<32x64xf32, #tpu.memory_space<vmem>>, vector<32x64xf32>
    %cst_57 = arith.constant dense<0.000000e+00> : vector<16x64xf32>
    %155 = tpu.matmul %153, %154, %cst_57 {dimension_numbers = #tpu.dot_dimension_numbers<[1], [0], [0], [1], [0, 0, 1, 1], [], []>} : vector<16x32xf32>, vector<32x64xf32>, vector<16x64xf32> -> vector<16x64xf32>
    %c0_58 = arith.constant 0 : index
    %c0_59 = arith.constant 0 : index
    %156 = vector.load %arg15[%c0_58, %c0_59] : memref<1x64xf32, #tpu.memory_space<vmem>>, vector<1x64xf32>
    %157 = vector.broadcast %156 : vector<1x64xf32> to vector<16x64xf32>
    %158 = arith.addf %155, %157 : vector<16x64xf32>
    %159 = arith.mulf %158, %158 : vector<16x64xf32>
    %160 = arith.mulf %158, %159 : vector<16x64xf32>
    %cst_60 = arith.constant 4.471500e-02 : f32
    %161 = vector.broadcast %cst_60 : f32 to vector<16x64xf32>
    %162 = arith.mulf %161, %160 : vector<16x64xf32>
    %163 = arith.addf %158, %162 : vector<16x64xf32>
    %cst_61 = arith.constant 0.797884583 : f32
    %164 = vector.broadcast %cst_61 : f32 to vector<16x64xf32>
    %165 = arith.mulf %164, %163 : vector<16x64xf32>
    %166 = math.tanh %165 : vector<16x64xf32>
    %cst_62 = arith.constant 1.000000e+00 : f32
    %167 = vector.broadcast %cst_62 : f32 to vector<16x64xf32>
    %168 = arith.addf %167, %166 : vector<16x64xf32>
    %cst_63 = arith.constant 5.000000e-01 : f32
    %169 = vector.broadcast %cst_63 : f32 to vector<16x64xf32>
    %170 = arith.mulf %169, %168 : vector<16x64xf32>
    %171 = arith.mulf %158, %170 : vector<16x64xf32>
    %c0_64 = arith.constant 0 : index
    %c0_65 = arith.constant 0 : index
    %172 = vector.load %arg16[%c0_64, %c0_65] : memref<64x32xf32, #tpu.memory_space<vmem>>, vector<64x32xf32>
    %cst_66 = arith.constant dense<0.000000e+00> : vector<16x32xf32>
    %173 = tpu.matmul %171, %172, %cst_66 {dimension_numbers = #tpu.dot_dimension_numbers<[1], [0], [0], [1], [0, 0, 1, 1], [], []>} : vector<16x64xf32>, vector<64x32xf32>, vector<16x32xf32> -> vector<16x32xf32>
    %c0_67 = arith.constant 0 : index
    %c0_68 = arith.constant 0 : index
    %174 = vector.load %arg17[%c0_67, %c0_68] : memref<1x32xf32, #tpu.memory_space<vmem>>, vector<1x32xf32>
    %175 = vector.broadcast %174 : vector<1x32xf32> to vector<16x32xf32>
    %176 = arith.addf %173, %175 : vector<16x32xf32>
    %177 = arith.addf %153, %176 : vector<16x32xf32>
    %c0_69 = arith.constant 0 : index
    %c0_70 = arith.constant 0 : index
    %178 = vector.load %arg18[%c0_69, %c0_70] : memref<1x32xf32, #tpu.memory_space<vmem>>, vector<1x32xf32>
    %c0_71 = arith.constant 0 : index
    %c0_72 = arith.constant 0 : index
    %179 = vector.load %arg19[%c0_71, %c0_72] : memref<1x32xf32, #tpu.memory_space<vmem>>, vector<1x32xf32>
    %cst_73 = arith.constant dense<0.000000e+00> : vector<16xf32>
    %180 = vector.multi_reduction <add>, %177, %cst_73 [1] : vector<16x32xf32> to vector<16xf32>
    %181 = vector.shape_cast %180 : vector<16xf32> to vector<16x1xf32>
    %cst_74 = arith.constant 3.200000e+01 : f32
    %182 = vector.broadcast %cst_74 : f32 to vector<16x1xf32>
    %183 = arith.divf %181, %182 : vector<16x1xf32>
    %184 = vector.broadcast %183 : vector<16x1xf32> to vector<16x32xf32>
    %185 = arith.subf %177, %184 : vector<16x32xf32>
    %186 = arith.mulf %185, %185 : vector<16x32xf32>
    %cst_75 = arith.constant dense<0.000000e+00> : vector<16xf32>
    %187 = vector.multi_reduction <add>, %186, %cst_75 [1] : vector<16x32xf32> to vector<16xf32>
    %188 = vector.shape_cast %187 : vector<16xf32> to vector<16x1xf32>
    %cst_76 = arith.constant 3.200000e+01 : f32
    %189 = vector.broadcast %cst_76 : f32 to vector<16x1xf32>
    %190 = arith.divf %188, %189 : vector<16x1xf32>
    %cst_77 = arith.constant 9.99999974E-6 : f32
    %191 = vector.broadcast %cst_77 : f32 to vector<16x1xf32>
    %192 = arith.addf %190, %191 : vector<16x1xf32>
    %193 = math.rsqrt %192 : vector<16x1xf32>
    %194 = vector.broadcast %193 : vector<16x1xf32> to vector<16x32xf32>
    %195 = arith.mulf %185, %194 : vector<16x32xf32>
    %196 = vector.broadcast %178 : vector<1x32xf32> to vector<16x32xf32>
    %197 = arith.mulf %195, %196 : vector<16x32xf32>
    %198 = vector.broadcast %179 : vector<1x32xf32> to vector<16x32xf32>
    %199 = arith.addf %197, %198 : vector<16x32xf32>
    %c0_78 = arith.constant 0 : index
    %c0_79 = arith.constant 0 : index
    %200 = vector.load %arg20[%c0_78, %c0_79] : memref<16x32xf32, #tpu.memory_space<vmem>>, vector<16x32xf32>
    tpu.vector_store %arg20[%c0_78, %c0_79], %199 {strides = array<i32>} : memref<16x32xf32, #tpu.memory_space<vmem>>, vector<16x32xf32>,
    return
  }
  func.func @transform_0(%arg0: i32) -> i32 {
    %c0_i32 = arith.constant 0 : i32
    %c0_i32_0 = arith.constant 0 : i32
    return %c0_i32 : i32
  }
  func.func @transform_1(%arg0: i32) -> (i32, i32) {
    %c0_i32 = arith.constant 0 : i32
    %c0_i32_0 = arith.constant 0 : i32
    %c0_i32_1 = arith.constant 0 : i32
    return %c0_i32, %c0_i32_0 : i32, i32
  }
  func.func @transform_2(%arg0: i32) -> (i32, i32) {
    %c0_i32 = arith.constant 0 : i32
    %c0_i32_0 = arith.constant 0 : i32
    %c0_i32_1 = arith.constant 0 : i32
    return %c0_i32, %c0_i32_0 : i32, i32
  }
  func.func @transform_3(%arg0: i32) -> (i32, i32) {
    %c0_i32 = arith.constant 0 : i32
    %c0_i32_0 = arith.constant 0 : i32
    %c0_i32_1 = arith.constant 0 : i32
    return %c0_i32, %c0_i32_0 : i32, i32
  }
  func.func @transform_4(%arg0: i32) -> (i32, i32) {
    %c0_i32 = arith.constant 0 : i32
    %c0_i32_0 = arith.constant 0 : i32
    %c0_i32_1 = arith.constant 0 : i32
    return %c0_i32, %c0_i32_0 : i32, i32
  }
  func.func @transform_5(%arg0: i32) -> (i32, i32) {
    %c0_i32 = arith.constant 0 : i32
    %c0_i32_0 = arith.constant 0 : i32
    %c0_i32_1 = arith.constant 0 : i32
    return %c0_i32, %c0_i32_0 : i32, i32
  }
  func.func @transform_6(%arg0: i32) -> (i32, i32) {
    %c0_i32 = arith.constant 0 : i32
    %c0_i32_0 = arith.constant 0 : i32
    %c0_i32_1 = arith.constant 0 : i32
    return %c0_i32, %c0_i32_0 : i32, i32
  }
  func.func @transform_7(%arg0: i32) -> (i32, i32) {
    %c0_i32 = arith.constant 0 : i32
    %c0_i32_0 = arith.constant 0 : i32
    %c0_i32_1 = arith.constant 0 : i32
    return %c0_i32, %c0_i32_0 : i32, i32
  }
  func.func @transform_8(%arg0: i32) -> (i32, i32) {
    %c0_i32 = arith.constant 0 : i32
    %c0_i32_0 = arith.constant 0 : i32
    %c0_i32_1 = arith.constant 0 : i32
    return %c0_i32, %c0_i32_0 : i32, i32
  }
  func.func @transform_9(%arg0: i32) -> (i32, i32) {
    %c0_i32 = arith.constant 0 : i32
    %c0_i32_0 = arith.constant 0 : i32
    %c0_i32_1 = arith.constant 0 : i32
    return %c0_i32, %c0_i32_0 : i32, i32
  }
  func.func @transform_10(%arg0: i32) -> (i32, i32) {
    %c0_i32 = arith.constant 0 : i32
    %c0_i32_0 = arith.constant 0 : i32
    %c0_i32_1 = arith.constant 0 : i32
    return %c0_i32, %c0_i32_0 : i32, i32
  }
  func.func @transform_11(%arg0: i32) -> (i32, i32) {
    %c0_i32 = arith.constant 0 : i32
    %c0_i32_0 = arith.constant 0 : i32
    %c0_i32_1 = arith.constant 0 : i32
    return %c0_i32, %c0_i32_0 : i32, i32
  }
  func.func @transform_12(%arg0: i32) -> (i32, i32) {
    %c0_i32 = arith.constant 0 : i32
    %c0_i32_0 = arith.constant 0 : i32
    %c0_i32_1 = arith.constant 0 : i32
    return %c0_i32, %c0_i32_0 : i32, i32
  }
  func.func @transform_13(%arg0: i32) -> (i32, i32) {
    %c0_i32 = arith.constant 0 : i32
    %c0_i32_0 = arith.constant 0 : i32
    %c0_i32_1 = arith.constant 0 : i32
    return %c0_i32, %c0_i32_0 : i32, i32
  }
  func.func @transform_14(%arg0: i32) -> (i32, i32) {
    %c0_i32 = arith.constant 0 : i32
    %c0_i32_0 = arith.constant 0 : i32
    %c0_i32_1 = arith.constant 0 : i32
    return %c0_i32, %c0_i32_0 : i32, i32
  }
  func.func @transform_15(%arg0: i32) -> (i32, i32) {
    %c0_i32 = arith.constant 0 : i32
    %c0_i32_0 = arith.constant 0 : i32
    %c0_i32_1 = arith.constant 0 : i32
    return %c0_i32, %c0_i32_0 : i32, i32
  }
  func.func @transform_16(%arg0: i32) -> (i32, i32) {
    %c0_i32 = arith.constant 0 : i32
    %c0_i32_0 = arith.constant 0 : i32
    %c0_i32_1 = arith.constant 0 : i32
    return %c0_i32, %c0_i32_0 : i32, i32
  }
  func.func @transform_17(%arg0: i32) -> (i32, i32) {
    %c0_i32 = arith.constant 0 : i32
    %c0_i32_0 = arith.constant 0 : i32
    %c0_i32_1 = arith.constant 0 : i32
    return %c0_i32, %c0_i32_0 : i32, i32
  }
  func.func @transform_18(%arg0: i32) -> (i32, i32) {
    %c0_i32 = arith.constant 0 : i32
    %c0_i32_0 = arith.constant 0 : i32
    %c0_i32_1 = arith.constant 0 : i32
    return %c0_i32, %c0_i32_0 : i32, i32
  }
  func.func @transform_19(%arg0: i32) -> (i32, i32) {
    %c0_i32 = arith.constant 0 : i32
    %c0_i32_0 = arith.constant 0 : i32
    %c0_i32_1 = arith.constant 0 : i32
    return %c0_i32, %c0_i32_0 : i32, i32
  }
}

</mosaic_0001>

<bundles_post_ra>
// kernel: tpu_custom_call.1
= control target key start
LH: loop header
LB: loop body
LE: loop exit
PB: predicated region body
PF: predicated region fallthrough
CT: control target
= control target key end

     0   :  { %s1522_s0 = inlined_call_operand.<no memory space> [shape: f32[1], index: 0, kind: input, shape index: {}]   ;;  %s1523_s1 = inlined_call_operand.hbm [shape: f32[16,32], index: 1, kind: input, shape index: {}]   ;;  %s1524_s2 = inlined_call_operand.hbm [shape: f32[16,16], index: 2, kind: input, shape index: {}]   ;;  %s1525_s3 = inlined_call_operand.vmem [shape: f32[32,32], index: 3, kind: input, shape index: {}]   ;;  %s1526_s4 = inlined_call_operand.vmem [shape: f32[32,32], index: 4, kind: input, shape index: {}]   ;;  %s1527_s5 = inlined_call_operand.vmem [shape: f32[32,32], index: 5, kind: input, shape index: {}]   ;;  %s1528_s6 = inlined_call_operand.vmem [shape: f32[1,32], index: 6, kind: input, shape index: {}]   ;;  %s1529_s7 = inlined_call_operand.vmem [shape: f32[1,32], index: 7, kind: input, shape index: {}]   ;;  %s1530_s8 = inlined_call_operand.vmem [shape: f32[1,32], index: 8, kind: input, shape index: {}]   ;;  %s1531_s9 = inlined_call_operand.hbm [shape: f32[32,32], index: 9, kind: input, shape index: {}]   ;;  %s1532_s10 = inlined_call_operand.vmem [shape: f32[1,32], index: 10, kind: input, shape index: {}]   ;;  %s1533_s11 = inlined_call_operand.vmem [shape: f32[1,32], index: 11, kind: input, shape index: {}]   ;;  %s1534_s12 = inlined_call_operand.vmem [shape: f32[1,32], index: 12, kind: input, shape index: {}]   ;;  %s1535_s13 = inlined_call_operand.hbm [shape: f32[32,64], index: 13, kind: input, shape index: {}]   ;;  %s1536_s14 = inlined_call_operand.vmem [shape: f32[1,64], index: 14, kind: input, shape index: {}]   ;;  %s1537_s15 = inlined_call_operand.vmem [shape: f32[64,32], index: 15, kind: input, shape index: {}]   ;;  %s1538_s16 = inlined_call_operand.vmem [shape: f32[1,32], index: 16, kind: input, shape index: {}]   ;;  %s1539_s17 = inlined_call_operand.vmem [shape: f32[1,32], index: 17, kind: input, shape index: {}]   ;;  %s1540_s18 = inlined_call_operand.vmem [shape: f32[1,32], index: 18, kind: input, shape index: {}]   ;;  %s1541_s19 = inlined_call_operand.hbm [shape: f32[16,32], index: 19, kind: output, shape index: {}]  }
   0x1   :  { %1543 = sst [smem:[#allocation16_spill]] %s1522_s0 }
   0x2   :  { %1544 = sst [smem:[#allocation17_spill]] %s1523_s1 }
   0x3   :  { %1545 = sst [smem:[#allocation18_spill]] %s1524_s2 }
   0x4   :  { %1546 = sst [smem:[#allocation19_spill]] %s1525_s3 }
   0x5   :  { %25 = vsyncpa [#allocation4], 0 }
   0x6   :  { %26 = vsyncpa [#allocation7], 0 }
   0x7   :  { %27 = vsyncpa [#allocation10], 0 }
   0x8   :  { %28 = vsyncpa [#allocation5], 0  ;;  %s1547_s20 = sld [smem:[#allocation18_spill]]  ;;  %s1148_s1 = smov [#allocation6]  }
   0x9   :  { %s50_s22 = sshll.u32 %s1148_s1, 4  ;;  %s1548_s24 = sld [smem:[#allocation17_spill]]  ;;  %s51_s22 = int_to_ptr.vmem [resolvable:$true] %s50_s22 }
   0xa   :  { %s1149_s3 = smov 128   ;;  %s1150_s26 = smov 8  }
   0xb   :  { %s1151_s27 = smov [#allocation3]   ;;  %s73_s30 = sshll.u32 %s1531_s9, 4  ;;  %s74_s30 = int_to_ptr.hbm [resolvable:$true] %s73_s30 }
   0xc   :  { %s37_s28 = sshll.u32 %s1151_s27, 4  ;;  %s92_s2 = sshll.u32 %s1535_s13, 4  ;;  %s38_s28 = int_to_ptr.vmem [resolvable:$true] %s37_s28  ;;  %s93_s2 = int_to_ptr.hbm [resolvable:$true] %s92_s2 }
   0xd   :  { %s1152_s23 = smov [#allocation8]  }
   0xe   :  { %s48_s21 = sshll.u32 %s1547_s20, 4  ;;  %s49_s21 = int_to_ptr.hbm [resolvable:$true] %s48_s21 }
   0xf   :  { %s35_s25 = sshll.u32 %s1548_s24, 4  ;;  %s75_s24 = sshll.u32 %s1152_s23, 4  ;;  %s36_s25 = int_to_ptr.hbm [resolvable:$true] %s35_s25  ;;  %s76_s24 = int_to_ptr.vmem [resolvable:$true] %s75_s24 }
  0x10   :  { %56 = dma.hbm_to_vmem [thread:$0]  %s49_s21, 256, %s51_s22, [#allocation7], %s1149_s3, %s1149_s3, %s1150_s26  }
  0x11   :  { %43 = dma.hbm_to_vmem [thread:$0]  %s36_s25, 256, %s38_s28, [#allocation4], %s1149_s3, %s1149_s3, %s1150_s26  }
  0x12   :  { %81 = dma.hbm_to_vmem [thread:$0]  %s74_s30, 512, %s76_s24, [#allocation7], %s1149_s3, %s1149_s3, %s1150_s26  }
  0x13   :  { %s1153_s21 = smov [#allocation9]  }
  0x14   :  { %s94_s9 = sshll.u32 %s1153_s21, 4  ;;  %s95_s9 = int_to_ptr.vmem [resolvable:$true] %s94_s9 }
  0x15   :  { %100 = dma.hbm_to_vmem [thread:$0]  %s93_s2, 512, %s95_s9, [#allocation10], %s1149_s3, %s1149_s3, %s1150_s26  }
  0x16   :  { %1140 = dma.done.wait [#allocation4], 256  }
  0x17   :  { %1141 = vsyncadd [#allocation4], 4294967040 }
  0x18   :  { %1142 = dma.done.wait [#allocation7], 768  }
  0x19   :  { %1143 = vsyncadd [#allocation7], 4294966528 }
  0x1a   :  { %1144 = dma.done.wait [#allocation10], 512  }
  0x1b   :  { %1145 = vsyncadd [#allocation10], 4294966784  ;;  %s1549_s25 = sld [smem:[#allocation16_spill]]  ;;  %v194_v3 = vld [vmem:[%s1526_s4 + $0x18] sm:$0xff]  ;;  %v193_v7 = vld [vmem:[%s1526_s4 + $0x10] sm:$0xff]  ;;  %vm151_vm2 = vcmask 261120   ;;  %v255_v27 = vlaneseq }
  0x1c   :  { %s1550_s29 = sld [smem:[#allocation19_spill]]  ;;  %948 = vmatpush.msra.mxu3 %v194_v3  ;;  %v192_v10 = vld [vmem:[%s1526_s4 + $0x8] sm:$0xff]  ;;  %211 = vmatpush.msra.mxu1 %v194_v3  ;;  %v191_v12 = vld [vmem:[%s1526_s4] sm:$0xff]  ;;  %v225_v15 = vld [vmem:[%s1527_s5 + $0x18] sm:$0xff]  ;;  %v1154_v35 = vmov 0.0   ;;  %vm314_vm15 = vcmask 130048  }
  0x1d   :  { %v1308_v14 = vld [vmem:[#allocation3 + $0x8] sm:$0xff]  ;;  %v224_v21 = vld [vmem:[%s1527_s5 + $0x10] sm:$0xff]  ;;  %v1330_v22 = vld [vmem:[#allocation3] sm:$0xff]  ;;  %v256_v28 = vand.u32 127, %v255_v27  ;;  %s889_s30 = sshll.u32 %s1541_s19, 4  ;;  %s890_s30 = int_to_ptr.hbm [resolvable:$true] %s889_s30 }
  0x1e   :  { %949 = vmatpush.msra.mxu3 %v193_v7  ;;  %212 = vmatpush.msra.mxu1 %v193_v7  ;;  %v223_v24 = vld [vmem:[%s1527_s5 + $0x8] sm:$0xff]  ;;  %v222_v26 = vld [vmem:[%s1527_s5] sm:$0xff] }
  0x1f   :  { %vm262_vm5 = vcmp.ge.s32.totalorder %v256_v28, 8  ;;  %vm263_vm6 = vcmp.lt.s32.totalorder %v256_v28, 16  ;;  %v963_v29 = vld [vmem:[%s1529_s7] ss:$0 sm:$0xff]  ;;  %vm258_vm7 = vcmp.lt.s32.totalorder %v256_v28, 8  ;;  %vm267_vm9 = vcmp.ge.s32.totalorder %v256_v28, 16 }
  0x20   :  { %950 = vmatpush.msra.mxu3 %v192_v10  ;;  %213 = vmatpush.msra.mxu1 %v192_v10  ;;  %v184_v30 = vld [vmem:[%s1528_s6] sm:$0x1]  ;;  %vm264_vm8 = vmand %vm262_vm5, %vm263_vm6  ;;  %vm268_vm10 = vcmp.lt.s32.totalorder %v256_v28, 24  ;;  %v1356_v36 = vsel %vm258_vm7, 1.0, %v1154_v35  ;;  %vm272_vm12 = vcmp.ge.s32.totalorder %v256_v28, 24  ;;  %vm273_vm13 = vcmp.lt.s32.totalorder %v256_v28, 32 }
  0x21   :  { %v130_v0 = vstv %s1549_s25  ;;  %v185_v34 = vmul.f32 0.35355338, %v184_v30  ;;  %v911_v40 = vsel %vm264_vm8, 1.0, %v1154_v35  ;;  %vm269_vm11 = vmand %vm267_vm9, %vm268_vm10  ;;  %v964_v53 = vld [vmem:[%s1530_s8] ss:$0 sm:$0xff]  ;;  %vm793_vm8 = vcmask 523264  }
  0x22   :  { %972 = vrcp.f32 %v130_v0  ;;  %v150_v2 = vld [vmem:[%s1550_s29 + $0x18] sm:$0xff]  ;;  %v149_v4 = vld [vmem:[%s1550_s29 + $0x10] sm:$0xff]  ;;  %v140_v5 = vand.u32 2147483647, %v130_v0  ;;  %v142_v6 = vand.u32 2147483648, %v130_v0  ;;  %vm136_vm0 = vweird.f32 %v130_v0  ;;  %v148_v9 = vld [vmem:[%s1550_s29 + $0x8] sm:$0xff]  ;;  %951 = vmatpush.msra.mxu3 %v191_v12  ;;  %214 = vmatpush.msra.mxu1 %v191_v12 }
  0x23   :  { %944 = vmatpush.msra.mxu2 %v150_v2  ;;  %170 = vmatpush.msra.mxu0 %v150_v2  ;;  %v147_v11 = vld [vmem:[%s1550_s29] sm:$0xff]  ;;  %v187_v43 = vperm.slane %v185_v34, 0  ;;  %v1359_v46 = vsel %vm269_vm11, 1.0, %v1154_v35  ;;  %vm274_vm14 = vmand %vm272_vm12, %vm273_vm13 }
  0x24   :  { %vm1319_vm4 = vcmp.eq.f32.partialorder %v140_v5, 8.507059e+37  ;;  %v143_v18 = vor.u32 1.1754944e-38, %v142_v6  ;;  %907 = vmatmul.msk.f32.vlgmr.msra.gmra.mxu3 %vm151_vm2, %v1308_v14  ;;  %906 = vmatmul.msk.f32.vlgmr.msra.gmra.mxu1 %vm151_vm2, %v1330_v22  ;;  %v913_v59 = vsel %vm274_vm14, 1.0, %v1154_v35  ;;  %v1396_v6 = vld [vmem:[#allocation6 + $0x8] sm:$0xff] }
  0x25   :  { %945 = vmatpush.msra.mxu2 %v149_v4  ;;  %171 = vmatpush.msra.mxu0 %v149_v4 }
  0x27   :  { %946 = vmatpush.msra.mxu2 %v148_v9  ;;  %172 = vmatpush.msra.mxu0 %v148_v9 }
  0x28   :  { %v973_v1 = vpop.eup %972 }
  0x29   :  { %v132_v8 = vmul.f32 %v973_v1, %v130_v0  ;;  %vm137_vm1 = vweird.f32 %v973_v1  ;;  %947 = vmatpush.msra.mxu2 %v147_v11  ;;  %173 = vmatpush.msra.mxu0 %v147_v11  ;;  %v1391_v0 = vld [vmem:[#allocation6] sm:$0xff] }
  0x2a   :  { %vm1315_vm3 = vmor %vm136_vm0, %vm137_vm1  ;;  %905 = vmatmul.msk.f32.vlgmr.msra.gmra.mxu2 %vm151_vm2, %v1308_v14  ;;  %904 = vmatmul.msk.f32.vlgmr.msra.gmra.mxu0 %vm151_vm2, %v1330_v22 }
  0x2b   :  { %v133_v13 = vsub.f32 1.0, %v132_v8  ;;  %242 = vmatpush.msrb.mxu2 %v225_v15 }
  0x2d   :  { %v134_v19 = vmul.f32 %v973_v1, %v133_v13  ;;  %243 = vmatpush.msrb.mxu2 %v224_v21 }
  0x2f   :  { %v135_v20 = vadd.f32 %v973_v1, %v134_v19  ;;  %244 = vmatpush.msrb.mxu2 %v223_v24 }
  0x31   :  { %v139_v23 = vsel %vm1315_vm3, %v973_v1, %v135_v20  ;;  %245 = vmatpush.msrb.mxu2 %v222_v26 }
  0x32   :  { %v144_v25 = vsel %vm1319_vm4, %v143_v18, %v139_v23  ;;  %908 = vmatmul.msk.f32.vlgmr.msrb.gmra.mxu2 %vm151_vm2, %v1330_v22 }
  0x33   :  { %952 = vpush %v144_v25 }
  0x3a   :  { %909 = vmatmul.msk.f32.gmra.mxu2 %vm151_vm2, %v1308_v14 }
  0x64   :  { %s953_s24 = spop %952 }
  0x65   :  { %s146_s21 = smul.f32 0.35355338, %s953_s24 }
  0x67   :  { %v181_v38 = vstv %s146_s21 }
  0xa1   :  { %v216_v31 = vpop.f32.mrf.mxu1 }
  0xa2   :  { %v217_v39 = vadd.f32 %v963_v29, %v216_v31 }
  0xa4   :  { %v277_v47 = vmul.f32 %v1356_v36, %v217_v39  ;;  %v339_v48 = vmul.f32 %v911_v40, %v217_v39  ;;  %v452_v52 = vmul.f32 %v1359_v46, %v217_v39  ;;  %v538_v63 = vmul.f32 %v913_v59, %v217_v39 }
  0xa7   :  { %v219_v33 = vpop.f32.mrf.mxu3  ;;  %v175_v41 = vpop.f32.mrf.mxu0 }
  0xa8   :  { %v220_v37 = vadd.f32 %v963_v29, %v219_v33  ;;  %v182_v45 = vmul.f32 %v181_v38, %v175_v41 }
  0xaa   :  { %v278_v42 = vmul.f32 %v1356_v36, %v220_v37  ;;  %v340_v44 = vmul.f32 %v911_v40, %v220_v37  ;;  %v453_v49 = vmul.f32 %v1359_v46, %v220_v37  ;;  %v1365_v50 = vadd.f32 %v187_v43, %v182_v45 }
  0xab   :  { %v539_v62 = vmul.f32 %v913_v59, %v220_v37 }
  0xac   :  { %914 = vmatpush.xpose.msk.msrb.mxu3 %vm151_vm2, %v278_v42  ;;  %918 = vmatpush.xpose.msk.msrb.mxu0 %vm151_vm2, %v340_v44 }
  0xad   :  { %v178_v32 = vpop.f32.mrf.mxu2 }
  0xae   :  { %v183_v54 = vmul.f32 %v181_v38, %v178_v32 }
  0xb0   :  { %915 = vmatpush.xpose.msk.msrb.mxu3 %vm151_vm2, %v277_v47  ;;  %919 = vmatpush.xpose.msk.msrb.mxu0 %vm151_vm2, %v339_v48  ;;  %v1379_v58 = vadd.f32 %v187_v43, %v183_v54 }
  0xb3   :  { %916 = vmatmul.msk.f32.vlgmr.msrb.gmra.mxu3 %vm151_vm2, %v1365_v50  ;;  %920 = vmatmul.msk.f32.vlgmr.msrb.gmra.mxu0 %vm151_vm2, %v1365_v50 }
  0xb4   :  { %926 = vmatpush.xpose.msk.msra.mxu3 %vm151_vm2, %v453_v49 }
  0xb5   :  { %v247_v51 = vpop.f32.mrf.mxu2 }
  0xb6   :  { %v248_v55 = vadd.f32 %v964_v53, %v247_v51 }
  0xb8   :  { %927 = vmatpush.xpose.msk.msra.mxu3 %vm151_vm2, %v452_v52  ;;  %v392_v61 = vmul.f32 %v911_v40, %v248_v55  ;;  %v337_v19 = vmul.f32 %v1356_v36, %v248_v55  ;;  %v505_v23 = vmul.f32 %v1359_v46, %v248_v55  ;;  %v591_v25 = vmul.f32 %v913_v59, %v248_v55 }
  0xbb   :  { %917 = vmatmul.msk.f32.gmra.mxu3 %vm151_vm2, %v1379_v58  ;;  %921 = vmatmul.msk.f32.gmra.mxu0 %vm151_vm2, %v1379_v58 }
  0xbd   :  { %v250_v56 = vpop.f32.mrf.mxu2 }
  0xbe   :  { %v251_v57 = vadd.f32 %v964_v53, %v250_v56 }
  0xc0   :  { %v393_v60 = vmul.f32 %v911_v40, %v251_v57  ;;  %v338_v18 = vmul.f32 %v1356_v36, %v251_v57  ;;  %v506_v20 = vmul.f32 %v1359_v46, %v251_v57  ;;  %v592_v21 = vmul.f32 %v913_v59, %v251_v57 }
  0xc2   :  { %414 = vmatpush.msrb.mxu1 %v393_v60  ;;  %443 = vmatpush.msra.mxu2 %v338_v18 }
  0xc3   :  { %928 = vmatmul.msk.f32.vlgmr.msra.gmra.mxu3 %vm151_vm2, %v1365_v50  ;;  %527 = vmatpush.msra.mxu0 %v506_v20 }
  0xc4   :  { %415 = vmatpush.msrb.mxu1 %v392_v61  ;;  %444 = vmatpush.msra.mxu2 %v337_v19 }
  0xc5   :  { %528 = vmatpush.msra.mxu0 %v505_v23 }
  0xc6   :  { %932 = vmatpush.xpose.msk.msra.mxu1 %vm151_vm2, %v539_v62  ;;  %613 = vmatpush.msrb.mxu2 %v592_v21 }
  0xc8   :  { %614 = vmatpush.msrb.mxu2 %v591_v25 }
  0xca   :  { %933 = vmatpush.xpose.msk.msra.mxu1 %vm151_vm2, %v538_v63 }
  0xcb   :  { %929 = vmatmul.msk.f32.gmra.mxu3 %vm151_vm2, %v1379_v58 }
 0x130   :  { %v364_v1 = vpop.f32.mrf.mxu0 }
 0x131   :  { %v365_v2 = vadd.f32 %v364_v1, %v1391_v0 }
 0x133   :  { %v370_v3 = vsel %vm314_vm15, %v365_v2, -inf }
 0x134   :  { %371 = vmax.xlane.f32.xlu0 %v370_v3 }
 0x136   :  { %v308_v4 = vpop.f32.mrf.mxu3 }
 0x137   :  { %v309_v5 = vadd.f32 %v308_v4, %v1391_v0 }
 0x138   :  { %v367_v7 = vpop.f32.mrf.mxu0 }
 0x139   :  { %v315_v8 = vsel %vm314_vm15, %v309_v5, -inf  ;;  %v368_v9 = vadd.f32 %v367_v7, %v1396_v6 }
 0x13a   :  { %316 = vmax.xlane.f32.xlu2 %v315_v8 }
 0x13b   :  { %v373_v10 = vsel %vm314_vm15, %v368_v9, -inf }
 0x13c   :  { %374 = vmax.xlane.f32.xlu0 %v373_v10 }
 0x13e   :  { %v311_v11 = vpop.f32.mrf.mxu3 }
 0x13f   :  { %v1402_v12 = vadd.f32 %v311_v11, %v1396_v6 }
 0x141   :  { %v318_v13 = vsel %vm314_vm15, %v1402_v12, -inf }
 0x142   :  { %319 = vmax.xlane.f32.xlu2 %v318_v13 }
 0x146   :  { %v477_v34 = vpop.f32.mrf.mxu3 }
 0x147   :  { %v478_v36 = vadd.f32 %v477_v34, %v1391_v0 }
 0x149   :  { %v483_v37 = vsel %vm314_vm15, %v478_v36, -inf }
 0x1a7   :  { %v372_v15 = vpop.xlane.xlu0 %371 }
 0x1a8   :  { %v376_v16 = vsub.f32 %v365_v2, %v372_v15  ;;  %v480_v2 = vpop.f32.mrf.mxu3 }
 0x1a9   :  { %v481_v3 = vadd.f32 %v480_v2, %v1396_v6 }
 0x1aa   :  { %v378_v17 = vmul.f32 1.442695, %v376_v16 }
 0x1ab   :  { %v486_v7 = vsel %vm314_vm15, %v481_v3, -inf }
 0x1ac   :  { %974 = vpow2.f32 %v378_v17 }
 0x1ad   :  { %v317_v30 = vpop.xlane.xlu2 %316 }
 0x1ae   :  { %v321_v32 = vsub.f32 %v309_v5, %v317_v30  ;;  %v626_v30 = vld [vmem:[#allocation8 + $0x10] sm:$0xff] }
 0x1af   :  { %v375_v24 = vpop.xlane.xlu0 %374 }
 0x1b0   :  { %v377_v26 = vsub.f32 %v368_v9, %v375_v24  ;;  %v323_v35 = vmul.f32 1.442695, %v321_v32  ;;  %v625_v32 = vld [vmem:[#allocation8 + $0x8] sm:$0xff] }
 0x1b2   :  { %v975_v27 = vpop.eup %974  ;;  %v380_v28 = vmul.f32 1.442695, %v377_v26 }
 0x1b3   :  { %v382_v29 = vsel %vm314_vm15, %v975_v27, 0.0 }
 0x1b4   :  { %976 = vpow2.f32 %v380_v28  ;;  %383 = vadd.xlane.f32.xlu1 %v382_v29  ;;  %v627_v29 = vld [vmem:[#allocation8 + $0x18] sm:$0xff] }
 0x1b5   :  { %978 = vpow2.f32 %v323_v35  ;;  %v320_v59 = vpop.xlane.xlu2 %319  ;;  %650 = vmatpush.msrb.mxu3 %v627_v29 }
 0x1b6   :  { %v322_v63 = vsub.f32 %v1402_v12, %v320_v59 }
 0x1b7   :  { %651 = vmatpush.msrb.mxu3 %v626_v30 }
 0x1b9   :  { %652 = vmatpush.msrb.mxu3 %v625_v32 }
 0x1ba   :  { %v977_v31 = vpop.eup %976 }
 0x1bb   :  { %v385_v33 = vsel %vm314_vm15, %v977_v31, 0.0  ;;  %v979_v38 = vpop.eup %978 }
 0x1bc   :  { %386 = vadd.xlane.f32.xlu1 %v385_v33  ;;  %v327_v39 = vsel %vm314_vm15, %v979_v38, 0.0 }
 0x1c4   :  { %484 = vmax.xlane.f32.xlu1 %v483_v37 }
 0x1cc   :  { %328 = vadd.xlane.f32.xlu1 %v327_v39 }
 0x227   :  { %v384_v40 = vpop.xlane.xlu1 %383 }
 0x228   :  { %980 = vrcp.f32 %v384_v40 }
 0x22e   :  { %v981_v41 = vpop.eup %980 }
 0x22f   :  { %v387_v42 = vpop.xlane.xlu1 %386  ;;  %v390_v43 = vmul.f32 %v981_v41, %v975_v27  ;;  %v624_v41 = vld [vmem:[#allocation8] sm:$0xff] }
 0x230   :  { %982 = vrcp.f32 %v387_v42  ;;  %653 = vmatpush.msrb.mxu3 %v624_v41 }
 0x231   :  { %922 = vmatmul.msk.f32.vlgmr.msrb.gmra.mxu1 %vm314_vm15, %v390_v43 }
 0x236   :  { %v983_v44 = vpop.eup %982 }
 0x237   :  { %v485_v45 = vpop.xlane.xlu1 %484  ;;  %v391_v46 = vmul.f32 %v983_v44, %v977_v31 }
 0x238   :  { %v489_v47 = vsub.f32 %v478_v36, %v485_v45 }
 0x239   :  { %923 = vmatmul.msk.f32.gmra.mxu1 %vm314_vm15, %v391_v46 }
 0x23a   :  { %v491_v48 = vmul.f32 1.442695, %v489_v47 }
 0x23c   :  { %984 = vpow2.f32 %v491_v48 }
 0x23f   :  { %v329_v49 = vpop.xlane.xlu1 %328 }
 0x240   :  { %986 = vrcp.f32 %v329_v49 }
 0x241   :  { %934 = vmatmul.msk.f32.vlgmr.msra.gmra.mxu1 %vm151_vm2, %v1365_v50 }
 0x242   :  { %v985_v51 = vpop.eup %984 }
 0x243   :  { %v495_v52 = vsel %vm314_vm15, %v985_v51, 0.0 }
 0x244   :  { %496 = vadd.xlane.f32.xlu1 %v495_v52 }
 0x246   :  { %v987_v53 = vpop.eup %986 }
 0x247   :  { %v335_v54 = vmul.f32 %v987_v53, %v979_v38 }
 0x249   :  { %924 = vmatmul.msk.f32.vlgmr.msra.gmra.mxu2 %vm314_vm15, %v335_v54  ;;  %935 = vmatmul.msk.f32.gmra.mxu1 %vm151_vm2, %v1379_v58  ;;  %v325_v58 = vmul.f32 1.442695, %v322_v63 }
 0x2ae   :  { %v1423_v55 = vpop.f32.mrf.mxu1 }
 0x2b6   :  { %v1425_v56 = vpop.f32.mrf.mxu1 }
 0x2b7   :  { %v497_v57 = vpop.xlane.xlu1 %496 }
 0x2b8   :  { %988 = vrcp.f32 %v497_v57  ;;  %v965_v57 = vld [vmem:[%s1532_s10] ss:$0 sm:$0xff] }
 0x2b9   :  { %990 = vpow2.f32 %v325_v58 }
 0x2be   :  { %v989_v60 = vpop.eup %988  ;;  %v563_v50 = vpop.f32.mrf.mxu1 }
 0x2bf   :  { %v503_v61 = vmul.f32 %v989_v60, %v985_v51  ;;  %v564_v62 = vadd.f32 %v563_v50, %v1391_v0  ;;  %v991_v0 = vpop.eup %990 }
 0x2c0   :  { %v330_v9 = vsel %vm314_vm15, %v991_v0, 0.0 }
 0x2c1   :  { %930 = vmatmul.msk.f32.vlgmr.msra.gmra.mxu0 %vm314_vm15, %v503_v61  ;;  %v569_v1 = vsel %vm314_vm15, %v564_v62, -inf }
 0x2c2   :  { %570 = vmax.xlane.f32.xlu0 %v569_v1  ;;  %v1155_v1 = vmov 32.0  }
 0x2c6   :  { %v566_v4 = vpop.f32.mrf.mxu1 }
 0x2c7   :  { %v567_v5 = vadd.f32 %v566_v4, %v1396_v6 }
 0x2c9   :  { %v572_v8 = vsel %vm314_vm15, %v567_v5, -inf }
 0x2ca   :  { %487 = vmax.xlane.f32.xlu0 %v486_v7  ;;  %573 = vmax.xlane.f32.xlu2 %v572_v8 }
 0x2cc   :  { %v446_v42 = vpop.f32.mrf.mxu2 }
 0x2cd   :  { %v447_v45 = vadd.f32 %v446_v42, %v1423_v55 }
 0x2d2   :  { %331 = vadd.xlane.f32.xlu2 %v330_v9 }
 0x335   :  { %v571_v10 = vpop.xlane.xlu0 %570 }
 0x336   :  { %v575_v11 = vsub.f32 %v564_v62, %v571_v10 }
 0x338   :  { %v577_v12 = vmul.f32 1.442695, %v575_v11 }
 0x33a   :  { %992 = vpow2.f32 %v577_v12 }
 0x33d   :  { %v488_v13 = vpop.xlane.xlu0 %487  ;;  %v574_v15 = vpop.xlane.xlu2 %573 }
 0x33e   :  { %v490_v16 = vsub.f32 %v481_v3, %v488_v13  ;;  %v576_v17 = vsub.f32 %v567_v5, %v574_v15  ;;  %v530_v44 = vpop.f32.mrf.mxu0 }
 0x33f   :  { %v536_v46 = vadd.f32 %v530_v44, %v447_v45 }
 0x340   :  { %v993_v6 = vpop.eup %992  ;;  %v493_v18 = vmul.f32 1.442695, %v490_v16  ;;  %v579_v19 = vmul.f32 1.442695, %v576_v17  ;;  %v729_v16 = vld [vmem:[#allocation9 + $0x18] sm:$0xff]  ;;  %v728_v17 = vld [vmem:[#allocation9 + $0x10] sm:$0xff] }
 0x341   :  { %v581_v20 = vsel %vm314_vm15, %v993_v6, 0.0  ;;  %752 = vmatpush.msrb.mxu0 %v729_v16  ;;  %v969_v16 = vld [vmem:[%s1538_s16] ss:$0 sm:$0xff] }
 0x342   :  { %994 = vpow2.f32 %v493_v18  ;;  %582 = vadd.xlane.f32.xlu0 %v581_v20  ;;  %v726_v18 = vld [vmem:[#allocation9] sm:$0xff] }
 0x343   :  { %996 = vpow2.f32 %v579_v19  ;;  %753 = vmatpush.msrb.mxu0 %v728_v17 }
 0x345   :  { %v332_v21 = vpop.xlane.xlu2 %331 }
 0x346   :  { %998 = vrcp.f32 %v332_v21 }
 0x348   :  { %v995_v23 = vpop.eup %994 }
 0x349   :  { %v997_v24 = vpop.eup %996  ;;  %v498_v25 = vsel %vm314_vm15, %v995_v23, 0.0 }
 0x34a   :  { %499 = vadd.xlane.f32.xlu0 %v498_v25  ;;  %v584_v26 = vsel %vm314_vm15, %v997_v24, 0.0 }
 0x34b   :  { %585 = vadd.xlane.f32.xlu2 %v584_v26 }
 0x34c   :  { %v999_v27 = vpop.eup %998 }
 0x34d   :  { %v336_v28 = vmul.f32 %v999_v27, %v991_v0 }
 0x34f   :  { %925 = vmatmul.msk.f32.gmra.mxu2 %vm314_vm15, %v336_v28 }
 0x3b5   :  { %v583_v31 = vpop.xlane.xlu0 %582 }
 0x3b6   :  { %1000 = vrcp.f32 %v583_v31 }
 0x3bc   :  { %v1001_v33 = vpop.eup %1000 }
 0x3bd   :  { %v589_v34 = vmul.f32 %v1001_v33, %v993_v6  ;;  %v500_v35 = vpop.xlane.xlu0 %499  ;;  %v727_v6 = vld [vmem:[#allocation9 + $0x8] sm:$0xff]  ;;  %v966_v33 = vld [vmem:[%s1533_s11] ss:$0 sm:$0xff] }
 0x3be   :  { %1002 = vrcp.f32 %v500_v35  ;;  %v586_v36 = vpop.xlane.xlu2 %585  ;;  %754 = vmatpush.msrb.mxu0 %v727_v6 }
 0x3bf   :  { %1004 = vrcp.f32 %v586_v36  ;;  %936 = vmatmul.msk.f32.vlgmr.msrb.gmra.mxu2 %vm314_vm15, %v589_v34 }
 0x3c0   :  { %1006 = vrcp.f32 %v1155_v1  ;;  %755 = vmatpush.msrb.mxu0 %v726_v18 }
 0x3c4   :  { %v1003_v37 = vpop.eup %1002 }
 0x3c5   :  { %v1005_v38 = vpop.eup %1004  ;;  %v504_v39 = vmul.f32 %v1003_v37, %v995_v23 }
 0x3c6   :  { %v590_v40 = vmul.f32 %v1005_v38, %v997_v24  ;;  %v1007_v2 = vpop.eup %1006  ;;  %v967_v38 = vld [vmem:[%s1534_s12] ss:$0 sm:$0xff] }
 0x3c7   :  { %931 = vmatmul.msk.f32.gmra.mxu0 %vm314_vm15, %v504_v39  ;;  %v672_v58 = vmul.f32 32.0, %v1007_v2  ;;  %vm676_vm0 = vweird.f32 %v1007_v2 }
 0x3c8   :  { %937 = vmatmul.msk.f32.gmra.mxu2 %vm314_vm15, %v590_v40 }
 0x3c9   :  { %v673_v3 = vsub.f32 1.0, %v672_v58 }
 0x3cb   :  { %v674_v4 = vmul.f32 %v1007_v2, %v673_v3 }
 0x3cd   :  { %v675_v5 = vadd.f32 %v1007_v2, %v674_v4 }
 0x3cf   :  { %v1454_v7 = vsel %vm676_vm0, %v1007_v2, %v675_v5 }
 0x3d2   :  { %v449_v43 = vpop.f32.mrf.mxu2 }
 0x3d3   :  { %v450_v51 = vadd.f32 %v449_v43, %v1425_v56 }
 0x442   :  { %v616_v47 = vpop.f32.mrf.mxu2 }
 0x443   :  { %v622_v48 = vadd.f32 %v616_v47, %v536_v46 }
 0x444   :  { %v533_v49 = vpop.f32.mrf.mxu0 }
 0x445   :  { %938 = vmatmul.msk.f32.vlgmr.msrb.gmra.mxu3 %vm151_vm2, %v622_v48  ;;  %v537_v52 = vadd.f32 %v533_v49, %v450_v51  ;;  %v788_v48 = vld [vmem:[%s1537_s15 + $0x38] sm:$0xff]  ;;  %v787_v49 = vld [vmem:[%s1537_s15 + $0x30] sm:$0xff]  ;;  %v786_v51 = vld [vmem:[%s1537_s15 + $0x28] sm:$0xff] }
 0x446   :  { %808 = vmatpush.msrb.mxu1 %v788_v48  ;;  %v970_v48 = vld [vmem:[%s1539_s17] ss:$0 sm:$0xff]  ;;  %s1156_s17 = smov [#allocation11]  }
 0x447   :  { %s887_s28 = sshll.u32 %s1156_s17, 4  ;;  %s888_s28 = int_to_ptr.vmem [resolvable:$true] %s887_s28 }
 0x448   :  { %809 = vmatpush.msrb.mxu1 %v787_v49 }
 0x44a   :  { %810 = vmatpush.msrb.mxu1 %v786_v51 }
 0x44b   :  { %v619_v53 = vpop.f32.mrf.mxu2 }
 0x44c   :  { %v623_v54 = vadd.f32 %v619_v53, %v537_v52  ;;  %v785_v52 = vld [vmem:[%s1537_s15 + $0x20] sm:$0xff]  ;;  %v784_v53 = vld [vmem:[%s1537_s15 + $0x18] sm:$0xff] }
 0x44d   :  { %811 = vmatpush.msrb.mxu1 %v785_v52 }
 0x44e   :  { %939 = vmatmul.msk.f32.gmra.mxu3 %vm151_vm2, %v623_v54  ;;  %v783_v54 = vld [vmem:[%s1537_s15 + $0x10] sm:$0xff] }
 0x44f   :  { %812 = vmatpush.msrb.mxu1 %v784_v53  ;;  %v971_v53 = vld [vmem:[%s1540_s18] ss:$0 sm:$0xff] }
 0x451   :  { %813 = vmatpush.msrb.mxu1 %v783_v54 }
 0x4c8   :  { %v655_v59 = vpop.f32.mrf.mxu3 }
 0x4c9   :  { %v656_v60 = vadd.f32 %v965_v57, %v655_v59  ;;  %v781_v59 = vld [vmem:[%s1537_s15] sm:$0xff] }
 0x4cb   :  { %v661_v55 = vadd.f32 %v656_v60, %v1330_v22  ;;  %v968_v60 = vld [vmem:[%s1536_s14] ss:$0 sm:$0xff] }
 0x4cd   :  { %v665_v50 = vsel %vm151_vm2, %v661_v55, 0.0 }
 0x4ce   :  { %666 = vadd.xlane.f32.xlu1 %v665_v50 }
 0x4d1   :  { %v658_v61 = vpop.f32.mrf.mxu3 }
 0x4d2   :  { %v659_v62 = vadd.f32 %v965_v57, %v658_v61  ;;  %v782_v57 = vld [vmem:[%s1537_s15 + $0x8] sm:$0xff] }
 0x4d3   :  { %814 = vmatpush.msrb.mxu1 %v782_v57 }
 0x4d4   :  { %v662_v56 = vadd.f32 %v659_v62, %v1308_v14 }
 0x4d5   :  { %815 = vmatpush.msrb.mxu1 %v781_v59 }
 0x4d6   :  { %v668_v63 = vsel %vm151_vm2, %v662_v56, 0.0 }
 0x4d7   :  { %669 = vadd.xlane.f32.xlu2 %v668_v63 }
 0x541   :  { %v667_v22 = vpop.xlane.xlu1 %666 }
 0x542   :  { %v678_v8 = vmul.f32 %v1454_v7, %v667_v22 }
 0x544   :  { %v680_v0 = vsub.f32 %v661_v55, %v678_v8 }
 0x546   :  { %v682_v9 = vmul.f32 %v680_v0, %v680_v0 }
 0x548   :  { %v684_v14 = vsel %vm151_vm2, %v682_v9, 0.0 }
 0x549   :  { %685 = vadd.xlane.f32.xlu0 %v684_v14 }
 0x54a   :  { %v670_v10 = vpop.xlane.xlu2 %669 }
 0x54b   :  { %v679_v11 = vmul.f32 %v1454_v7, %v670_v10 }
 0x54d   :  { %v681_v12 = vsub.f32 %v662_v56, %v679_v11 }
 0x54f   :  { %v683_v13 = vmul.f32 %v681_v12, %v681_v12 }
 0x551   :  { %v687_v15 = vsel %vm151_vm2, %v683_v13, 0.0 }
 0x552   :  { %688 = vadd.xlane.f32.xlu1 %v687_v15 }
 0x5bc   :  { %v686_v19 = vpop.xlane.xlu0 %685 }
 0x5bd   :  { %v690_v20 = vmul.f32 %v686_v19, %v1454_v7 }
 0x5bf   :  { %v692_v21 = vadd.f32 1e-05, %v690_v20 }
 0x5c1   :  { %1008 = vrsqrt.f32 %v692_v21  ;;  %vm700_vm3 = vweird.f32 %v692_v21 }
 0x5c5   :  { %v689_v23 = vpop.xlane.xlu1 %688 }
 0x5c6   :  { %v691_v24 = vmul.f32 %v689_v23, %v1454_v7 }
 0x5c7   :  { %v1009_v25 = vpop.eup %1008 }
 0x5c8   :  { %v695_v26 = vmul.f32 %v1009_v25, %v692_v21  ;;  %v693_v27 = vadd.f32 1e-05, %v691_v24  ;;  %vm701_vm1 = vweird.f32 %v1009_v25 }
 0x5c9   :  { %vm702_vm4 = vmor %vm700_vm3, %vm701_vm1 }
 0x5ca   :  { %v696_v28 = vmul.f32 %v1009_v25, %v695_v26  ;;  %1010 = vrsqrt.f32 %v693_v27  ;;  %vm710_vm6 = vweird.f32 %v693_v27 }
 0x5cc   :  { %v697_v29 = vmul.f32 0.5, %v696_v28 }
 0x5ce   :  { %v698_v30 = vsub.f32 1.5, %v697_v29 }
 0x5d0   :  { %v1011_v31 = vpop.eup %1010  ;;  %v699_v32 = vmul.f32 %v1009_v25, %v698_v30 }
 0x5d1   :  { %v705_v34 = vmul.f32 %v1011_v31, %v693_v27  ;;  %vm711_vm5 = vweird.f32 %v1011_v31 }
 0x5d2   :  { %v703_v35 = vsel %vm702_vm4, %v1009_v25, %v699_v32  ;;  %vm712_vm7 = vmor %vm710_vm6, %vm711_vm5 }
 0x5d3   :  { %v714_v36 = vmul.f32 %v703_v35, %v680_v0  ;;  %v706_v37 = vmul.f32 %v1011_v31, %v705_v34 }
 0x5d5   :  { %v719_v39 = vmul.f32 %v966_v33, %v714_v36  ;;  %v707_v40 = vmul.f32 0.5, %v706_v37 }
 0x5d7   :  { %v708_v41 = vsub.f32 1.5, %v707_v40  ;;  %v724_v42 = vadd.f32 %v967_v38, %v719_v39 }
 0x5d9   :  { %v709_v43 = vmul.f32 %v1011_v31, %v708_v41  ;;  %940 = vmatmul.msk.f32.vlgmr.msrb.gmra.mxu0 %vm151_vm2, %v724_v42 }
 0x5db   :  { %v713_v44 = vsel %vm712_vm7, %v1011_v31, %v709_v43 }
 0x5dc   :  { %v715_v45 = vmul.f32 %v713_v44, %v681_v12 }
 0x5de   :  { %v720_v46 = vmul.f32 %v966_v33, %v715_v45 }
 0x5e0   :  { %v725_v47 = vadd.f32 %v967_v38, %v720_v46 }
 0x5e2   :  { %941 = vmatmul.msk.f32.gmra.mxu0 %vm151_vm2, %v725_v47 }
 0x656   :  { %v757_v55 = vpop.f32.mrf.mxu0 }
 0x657   :  { %v758_v50 = vadd.f32 %v968_v60, %v757_v55 }
 0x659   :  { %v763_v61 = vmul.f32 %v758_v50, %v758_v50 }
 0x65b   :  { %v765_v62 = vmul.f32 %v763_v61, %v758_v50 }
 0x65d   :  { %v767_v56 = vmul.f32 0.044715, %v765_v62 }
 0x65f   :  { %v769_v63 = vadd.f32 %v767_v56, %v758_v50  ;;  %v760_v1 = vpop.f32.mrf.mxu0 }
 0x660   :  { %v761_v2 = vadd.f32 %v968_v60, %v760_v1 }
 0x661   :  { %v771_v58 = vmul.f32 0.7978846, %v769_v63 }
 0x662   :  { %v764_v3 = vmul.f32 %v761_v2, %v761_v2 }
 0x663   :  { %1012 = vtanh.f32 %v771_v58 }
 0x664   :  { %v766_v4 = vmul.f32 %v764_v3, %v761_v2 }
 0x666   :  { %v768_v5 = vmul.f32 0.044715, %v766_v4 }
 0x668   :  { %v770_v22 = vadd.f32 %v768_v5, %v761_v2 }
 0x669   :  { %v1013_v8 = vpop.eup %1012 }
 0x66a   :  { %v775_v0 = vadd.f32 1.0, %v1013_v8  ;;  %v772_v9 = vmul.f32 0.7978846, %v770_v22 }
 0x66c   :  { %v777_v14 = vmul.f32 0.5, %v775_v0  ;;  %1014 = vtanh.f32 %v772_v9 }
 0x66e   :  { %v779_v10 = vmul.f32 %v777_v14, %v758_v50 }
 0x670   :  { %942 = vmatmul.msk.f32.vlgmr.msrb.gmra.mxu1 %vm793_vm8, %v779_v10 }
 0x672   :  { %v1015_v11 = vpop.eup %1014 }
 0x673   :  { %v776_v12 = vadd.f32 1.0, %v1015_v11 }
 0x675   :  { %v778_v13 = vmul.f32 0.5, %v776_v12 }
 0x677   :  { %v780_v15 = vmul.f32 %v778_v13, %v761_v2 }
 0x679   :  { %943 = vmatmul.msk.f32.gmra.mxu1 %vm793_vm8, %v780_v15 }
 0x6ed   :  { %v817_v17 = vpop.f32.mrf.mxu1 }
 0x6ee   :  { %v818_v6 = vadd.f32 %v969_v16, %v817_v17 }
 0x6f0   :  { %v823_v18 = vadd.f32 %v818_v6, %v724_v42 }
 0x6f2   :  { %v827_v19 = vsel %vm151_vm2, %v823_v18, 0.0 }
 0x6f3   :  { %828 = vadd.xlane.f32.xlu2 %v827_v19 }
 0x6f6   :  { %v820_v20 = vpop.f32.mrf.mxu1 }
 0x6f7   :  { %v821_v21 = vadd.f32 %v969_v16, %v820_v20 }
 0x6f9   :  { %v824_v23 = vadd.f32 %v821_v21, %v725_v47 }
 0x6fb   :  { %v830_v24 = vsel %vm151_vm2, %v824_v23, 0.0 }
 0x6fc   :  { %831 = vadd.xlane.f32.xlu0 %v830_v24 }
 0x766   :  { %v829_v25 = vpop.xlane.xlu2 %828 }
 0x767   :  { %v833_v26 = vmul.f32 %v829_v25, %v1454_v7 }
 0x769   :  { %v835_v27 = vsub.f32 %v823_v18, %v833_v26 }
 0x76b   :  { %v837_v28 = vmul.f32 %v835_v27, %v835_v27 }
 0x76d   :  { %v839_v29 = vsel %vm151_vm2, %v837_v28, 0.0 }
 0x76e   :  { %840 = vadd.xlane.f32.xlu1 %v839_v29 }
 0x76f   :  { %v832_v30 = vpop.xlane.xlu0 %831 }
 0x770   :  { %v834_v31 = vmul.f32 %v832_v30, %v1454_v7 }
 0x772   :  { %v836_v32 = vsub.f32 %v824_v23, %v834_v31 }
 0x774   :  { %v838_v33 = vmul.f32 %v836_v32, %v836_v32 }
 0x776   :  { %v842_v34 = vsel %vm151_vm2, %v838_v33, 0.0 }
 0x777   :  { %843 = vadd.xlane.f32.xlu2 %v842_v34 }
 0x7e1   :  { %v841_v35 = vpop.xlane.xlu1 %840 }
 0x7e2   :  { %v845_v36 = vmul.f32 %v841_v35, %v1454_v7 }
 0x7e4   :  { %v847_v37 = vadd.f32 1e-05, %v845_v36 }
 0x7e6   :  { %1016 = vrsqrt.f32 %v847_v37  ;;  %vm855_vm10 = vweird.f32 %v847_v37 }
 0x7ea   :  { %v844_v38 = vpop.xlane.xlu2 %843 }
 0x7eb   :  { %v846_v39 = vmul.f32 %v844_v38, %v1454_v7 }
 0x7ec   :  { %v1017_v40 = vpop.eup %1016 }
 0x7ed   :  { %v850_v41 = vmul.f32 %v1017_v40, %v847_v37  ;;  %v848_v42 = vadd.f32 1e-05, %v846_v39  ;;  %vm856_vm9 = vweird.f32 %v1017_v40 }
 0x7ee   :  { %vm857_vm11 = vmor %vm855_vm10, %vm856_vm9 }
 0x7ef   :  { %v851_v43 = vmul.f32 %v1017_v40, %v850_v41  ;;  %1018 = vrsqrt.f32 %v848_v42  ;;  %vm865_vm13 = vweird.f32 %v848_v42 }
 0x7f1   :  { %v852_v44 = vmul.f32 0.5, %v851_v43 }
 0x7f3   :  { %v853_v45 = vsub.f32 1.5, %v852_v44 }
 0x7f5   :  { %v1019_v46 = vpop.eup %1018  ;;  %v854_v47 = vmul.f32 %v1017_v40, %v853_v45 }
 0x7f6   :  { %v860_v49 = vmul.f32 %v1019_v46, %v848_v42  ;;  %vm866_vm12 = vweird.f32 %v1019_v46 }
 0x7f7   :  { %v858_v51 = vsel %vm857_vm11, %v1017_v40, %v854_v47  ;;  %vm867_vm14 = vmor %vm865_vm13, %vm866_vm12 }
 0x7f8   :  { %v869_v52 = vmul.f32 %v858_v51, %v835_v27  ;;  %v861_v7 = vmul.f32 %v1019_v46, %v860_v49 }
 0x7fa   :  { %v874_v54 = vmul.f32 %v970_v48, %v869_v52  ;;  %v862_v57 = vmul.f32 0.5, %v861_v7 }
 0x7fc   :  { %v863_v59 = vsub.f32 1.5, %v862_v57  ;;  %v879_v60 = vadd.f32 %v971_v53, %v874_v54 }
 0x7fe   :  { %v864_v55 = vmul.f32 %v1019_v46, %v863_v59  ;;  %881 = vst.msk [vmem:[#allocation11] sm:$0xff] %vm151_vm2, %v879_v60 }
 0x800   :  { %v868_v50 = vsel %vm867_vm14, %v1019_v46, %v864_v55 }
 0x801   :  { %v870_v61 = vmul.f32 %v868_v50, %v836_v32 }
 0x803   :  { %v875_v62 = vmul.f32 %v970_v48, %v870_v61 }
 0x805   :  { %v880_v56 = vadd.f32 %v971_v53, %v875_v62 }
 0x807   :  { %882 = vst.msk [vmem:[#allocation11 + $0x8] sm:$0xff] %vm151_vm2, %v880_v56 }
 0x808   :  { %895 = dma.vmem_to_hbm [thread:$0]  %s888_s28, 256, %s890_s30, [#allocation5], %s1149_s3, %s1149_s3, %s1150_s26  }
 0x809   :  { %1146 = dma.done.wait [#allocation5], 256  }
 0x80a   :  { %1147 = vsyncadd [#allocation5], 4294967040 }
 0x80b   :  { %900 = vsyncpa [#allocation4], 1 }
 0x80c   :  { %901 = vsyncpa [#allocation7], 1 }
 0x80d   :  { %902 = vsyncpa [#allocation10], 1 }
 0x80e   :  { %903 = vsyncpa [#allocation5], 1 }

</bundles_post_ra>
